<compile_context>
chip_gen: v6e
topology: v6e:2x2x1
jax: 0.10.0
libtpu: 0.0.40
codegen_flags: <defaults>
</compile_context>

<pallas_src>
import jax
import jax.numpy as jnp
from jax.experimental import pallas as pl
from jax.experimental.pallas import tpu as pltpu


# ----------------------------- Pallas kernel ------------------------------ #
def glstm_kernel(x_ref, hc_ref, a_ref, w_ref, bias_ref, out_ref):
    n, _ = x_ref.shape
    cout = hc_ref.shape[1] // 2
    num_rel = a_ref.shape[0] // n
    mxu_dtype = a_ref.dtype

    hc = hc_ref[...]                          # (N, 2*Cout) f32, packed [h0 | c0]
    h0 = hc[:, :cout]
    c0 = hc[:, cout:]

    # In-kernel feature fusion (no wrapper-side HBM round trip for feat).
    feat = jnp.concatenate([x_ref[...], h0], axis=1).astype(mxu_dtype)   # (N, Cf)

    # Message passing for all relations in one tall matmul:
    #   (R*N, N) @ (N, Cf) -> (R*N, Cf), f32 accumulate, one bf16 rounding.
    ax = jnp.dot(a_ref[...], feat, preferred_element_type=jnp.float32)
    ax = ax.astype(mxu_dtype)

    # K-stacked fused projection: [feat | A_0 feat | ... | A_{R-1} feat] against
    # the row-stacked weight -> single MXU call, K = (R+1)*Cf.
    pieces = [feat] + [ax[r * n:(r + 1) * n, :] for r in range(num_rel)]
    feat_stacked = jnp.concatenate(pieces, axis=1)        # (N, (R+1)*Cf) bf16

    g = jnp.dot(feat_stacked, w_ref[...],
                preferred_element_type=jnp.float32) + bias_ref[...]   # (N, 4*Cout)

    # Gate columns pre-permuted to [f, i, o | c]; c columns pre-scaled by 2, so
    # tanh(z) = 2*sigmoid(2z) - 1: one full-128-lane sigmoid (EUP) + lane-masked
    # affine fix-up (VPU) instead of two partial transcendental passes.
    s = jax.nn.sigmoid(g)
    lane = jax.lax.broadcasted_iota(jnp.int32, g.shape, dimension=1)
    gates = jnp.where(lane >= 3 * cout, 2.0 * s - 1.0, s)

    forgetgate = gates[:, :cout]
    inputgate = gates[:, cout:2 * cout]
    outputgate = gates[:, 2 * cout:3 * cout]
    cellgate = gates[:, 3 * cout:]

    next_c = forgetgate * c0 + inputgate * cellgate
    next_h = outputgate * jnp.tanh(next_c)

    # Packed [next_h | next_c] store, aliased onto the packed [h0 | c0] input.
    out_ref[...] = jnp.concatenate([next_h, next_c], axis=1).astype(out_ref.dtype)


# ------------------------- one-time layout prep ---------------------------- #
def _permute_gate_cols(w, axis):
    """Reorder gate chunks [f, i, c, o] -> [f, i, o, c] along `axis`."""
    f, i, c, o = jnp.split(w, 4, axis=axis)
    return jnp.concatenate([f, i, o, c], axis=axis)


def prepare_glstm_params(adj, wi_rel, wi_root, wh_rel, wh_root, bias,
                         mxu_dtype=jnp.bfloat16):
    """Loop-invariant prep, hoisted out of the per-step call.

    For multi-timestep rollouts call this ONCE and reuse (a_stack, w_stack,
    bias_p) for every step; nothing here should run per timestep.
    """
    r, n, _ = adj.shape
    cout = wi_root.shape[1] // 4
    # Per-relation row slices of ax inside the kernel are free aligned views only
    # when N is a multiple of the bf16 sublane tile (16).
    assert n % 16 == 0, "pad num_nodes to a multiple of 16 for aligned row slices"

    # Gate permute [f,i,c,o] -> [f,i,o,c], done once at trace time.
    wi_root_p = _permute_gate_cols(wi_root, 1)
    wh_root_p = _permute_gate_cols(wh_root, 1)
    wi_rel_p = _permute_gate_cols(wi_rel, 2)
    wh_rel_p = _permute_gate_cols(wh_rel, 2)
    bias_p = _permute_gate_cols(bias, 1)

    # Fused x/h feature path: weight rows follow feat = [x | h0].
    w_root = jnp.concatenate([wi_root_p, wh_root_p], axis=0)     # (Cf, 4*Cout)
    w_rel = jnp.concatenate([wi_rel_p, wh_rel_p], axis=1)        # (R, Cf, 4*Cout)

    # K-stack root + per-relation weights for the single fused projection matmul.
    w_stack = jnp.concatenate([w_root] + [w_rel[i] for i in range(r)], axis=0)

    # tanh(z) = 2*sigmoid(2z) - 1 trick: pre-scale cell-gate columns by 2 so the
    # kernel needs only one full-lane sigmoid.
    scale = jnp.concatenate([jnp.ones((3 * cout,), w_stack.dtype),
                             jnp.full((cout,), 2.0, w_stack.dtype)])
    w_stack = w_stack * scale[None, :]
    bias_p = (bias_p * scale[None, :]).astype(jnp.float32)

    # Stacked dense adjacency, cast once to the MXU dtype (not per step).
    a_stack = adj.reshape(r * n, n).astype(mxu_dtype)
    return a_stack, w_stack.astype(mxu_dtype), bias_p


# ------------------------------ per-step call ------------------------------ #
@jax.jit
def glstm_step(x, hc, a_stack, w_stack, bias_p):
    """One GLSTMCell step on pre-laid-out params; hc is the packed [h0 | c0]."""
    n, cin = x.shape
    cout2 = hc.shape[1]
    cout = cout2 // 2
    r = a_stack.shape[0] // n
    cfeat = cin + cout

    flops = 2 * (r * n) * n * cfeat + 2 * n * ((r + 1) * cfeat) * (4 * cout)
    bytes_accessed = (a_stack.size * a_stack.dtype.itemsize
                      + w_stack.size * w_stack.dtype.itemsize
                      + x.size * x.dtype.itemsize
                      + 2 * hc.size * hc.dtype.itemsize
                      + bias_p.size * bias_p.dtype.itemsize)

    vmem = pl.BlockSpec(memory_space=pltpu.MemorySpace.VMEM)
    out = pl.pallas_call(
        glstm_kernel,
        out_shape=jax.ShapeDtypeStruct((n, cout2), hc.dtype),
        in_specs=[vmem] * 5,
        out_specs=vmem,
        input_output_aliases={1: 0},   # [h0|c0] buffer reused for [next_h|next_c]
        cost_estimate=pl.CostEstimate(
            flops=flops,
            transcendentals=n * 5 * cout,      # sigmoid(4*Cout) + tanh(Cout)
            bytes_accessed=bytes_accessed),
    )(x, hc, a_stack, w_stack, bias_p)
    return out


def glstm_cell(x, h0, c0, adj, wi_rel, wi_root, wh_rel, wh_root, bias):
    """Convenience one-shot wrapper: prep (once) + one step + unpack."""
    a_stack, w_stack, bias_p = prepare_glstm_params(
        adj, wi_rel, wi_root, wh_rel, wh_root, bias)
    hc = jnp.concatenate([h0, c0], axis=1)
    out = glstm_step(x, hc, a_stack, w_stack, bias_p)
    cout = h0.shape[1]
    return out[:, :cout], out[:, cout:]


# ----------------------------- pure-JAX reference -------------------------- #
def glstm_ref(x, h0, c0, adj, wi_rel, wi_root, wh_rel, wh_root, bias):
    def rgcn(feat, w_rel, w_root):
        out = feat @ w_root
        for r in range(adj.shape[0]):
            out = out + (adj[r] @ feat) @ w_rel[r]
        return out
    gi = rgcn(x, wi_rel, wi_root)
    gh = rgcn(h0, wh_rel, wh_root)
    g = gi + gh + bias
    cout = h0.shape[1]
    i_f, i_i, i_c, i_o = (g[:, k * cout:(k + 1) * cout] for k in range(4))
    f = jax.nn.sigmoid(i_f)
    i = jax.nn.sigmoid(i_i)
    cg = jnp.tanh(i_c)
    o = jax.nn.sigmoid(i_o)
    nc = f * c0 + i * cg
    nh = o * jnp.tanh(nc)
    return nh, nc


# --------------------------------- main ------------------------------------ #
if __name__ == "__main__":
    # small, module-consistent sizes
    N = 80               # num_nodes (module default)
    CIN = 8              # in_channels
    COUT = 32            # out_channels
    NCHUNKS = 4
    R = 3                # num_relations
    NB = 3               # num_bases
    E = 320              # num edges
    dtype = jnp.float32

    key = jax.random.PRNGKey(0)
    ks = jax.random.split(key, 12)

    # node features / hidden state
    x = jax.random.normal(ks[0], (N, CIN), dtype)
    h0 = jax.random.normal(ks[1], (N, COUT), dtype) * 0.1
    c0 = jax.random.normal(ks[2], (N, COUT), dtype) * 0.1

    # random relational graph: edge_index (2, E), edge_attr in [0, R)
    src = jax.random.randint(ks[3], (E,), 0, N)
    dst = jax.random.randint(ks[4], (E,), 0, N)
    edge_attr = jax.random.randint(ks[5], (E,), 0, R)
    # dense per-relation adjacency: A[r, target, source] += 1 ("add" aggregation)
    adj = jnp.zeros((R, N, N), dtype).at[edge_attr, dst, src].add(1.0)

    # RGCNConv (bias=False, K=1) parameters — basis decomposition:
    #   W_r = att[r] @ basis, plus a root (self-loop) weight.
    def make_rgcn_weights(kb, ka, kr, cin, cout_conv):
        scale = 1.0 / jnp.sqrt(jnp.array(cin, dtype))
        basis = jax.random.normal(kb, (NB, cin, cout_conv), dtype) * scale
        att = jax.random.normal(ka, (R, NB), dtype) * (1.0 / NB)
        root = jax.random.normal(kr, (cin, cout_conv), dtype) * scale
        w_rel = jnp.einsum("rb,bio->rio", att, basis)     # (R, cin, cout_conv)
        return w_rel, root

    wi_rel, wi_root = make_rgcn_weights(ks[6], ks[7], ks[8], CIN, COUT * NCHUNKS)
    wh_rel, wh_root = make_rgcn_weights(ks[9], ks[10], ks[11], COUT, COUT * NCHUNKS)

    # bias_f, bias_i, bias_c, bias_o are all initialized to ones (reset_parameters)
    bias = jnp.ones((1, NCHUNKS * COUT), dtype)

    nh, nc = glstm_cell(x, h0, c0, adj, wi_rel, wi_root, wh_rel, wh_root, bias)
    jax.block_until_ready((nh, nc))

    nh_ref, nc_ref = glstm_ref(x, h0, c0, adj, wi_rel, wi_root, wh_rel, wh_root, bias)
    # bf16 MXU operands -> loosened tolerance vs. the f32 reference.
    assert jnp.allclose(nh, nh_ref, atol=5e-2, rtol=5e-2), "next_h mismatch"
    assert jnp.allclose(nc, nc_ref, atol=5e-2, rtol=5e-2), "next_c mismatch"

    print("KERNEL_OK")
</pallas_src>

<mosaic_0001>
module attributes {stable_mosaic.version = 11 : i64} {
  func.func @glstm_kernel(%arg0: memref<80x8xf32, #tpu.memory_space<vmem>>, %arg1: memref<80x64xf32, #tpu.memory_space<vmem>>, %arg2: memref<240x80xbf16, #tpu.memory_space<vmem>>, %arg3: memref<160x128xbf16, #tpu.memory_space<vmem>>, %arg4: memref<1x128xf32, #tpu.memory_space<vmem>>, %arg5: memref<80x64xf32, #tpu.memory_space<vmem>>) attributes {dimension_semantics = [], scalar_prefetch = 0 : i64, scratch_operands = 0 : i64, tpu.core_type = #tpu.core_type<tc>} {
    %c0 = arith.constant 0 : index
    %c0_0 = arith.constant 0 : index
    %0 = vector.load %arg1[%c0, %c0_0] : memref<80x64xf32, #tpu.memory_space<vmem>>, vector<80x64xf32>
    %1 = vector.extract_strided_slice %0 {offsets = [0, 0], sizes = [80, 32], strides = [1, 1]} : vector<80x64xf32> to vector<80x32xf32>
    %2 = vector.extract_strided_slice %0 {offsets = [0, 32], sizes = [80, 32], strides = [1, 1]} : vector<80x64xf32> to vector<80x32xf32>
    %c0_1 = arith.constant 0 : index
    %c0_2 = arith.constant 0 : index
    %3 = vector.load %arg0[%c0_1, %c0_2] : memref<80x8xf32, #tpu.memory_space<vmem>>, vector<80x8xf32>
    %4 = tpu.concatenate %3, %1 in 1 : vector<80x8xf32>, vector<80x32xf32> -> vector<80x40xf32>
    %5 = arith.truncf %4 : vector<80x40xf32> to vector<80x40xbf16>
    %c0_3 = arith.constant 0 : index
    %c0_4 = arith.constant 0 : index
    %6 = vector.load %arg2[%c0_3, %c0_4] : memref<240x80xbf16, #tpu.memory_space<vmem>>, vector<240x80xbf16>
    %cst = arith.constant dense<0.000000e+00> : vector<240x40xf32>
    %7 = tpu.matmul %6, %5, %cst {dimension_numbers = #tpu.dot_dimension_numbers<[1], [0], [0], [1], [0, 0, 1, 1], [], []>} : vector<240x80xbf16>, vector<80x40xbf16>, vector<240x40xf32> -> vector<240x40xf32>
    %8 = arith.truncf %7 : vector<240x40xf32> to vector<240x40xbf16>
    %9 = vector.extract_strided_slice %8 {offsets = [0, 0], sizes = [80, 40], strides = [1, 1]} : vector<240x40xbf16> to vector<80x40xbf16>
    %10 = vector.extract_strided_slice %8 {offsets = [80, 0], sizes = [80, 40], strides = [1, 1]} : vector<240x40xbf16> to vector<80x40xbf16>
    %11 = vector.extract_strided_slice %8 {offsets = [160, 0], sizes = [80, 40], strides = [1, 1]} : vector<240x40xbf16> to vector<80x40xbf16>
    %12 = tpu.concatenate %5, %9, %10, %11 in 1 : vector<80x40xbf16>, vector<80x40xbf16>, vector<80x40xbf16>, vector<80x40xbf16> -> vector<80x160xbf16>
    %c0_5 = arith.constant 0 : index
    %c0_6 = arith.constant 0 : index
    %13 = vector.load %arg3[%c0_5, %c0_6] : memref<160x128xbf16, #tpu.memory_space<vmem>>, vector<160x128xbf16>
    %cst_7 = arith.constant dense<0.000000e+00> : vector<80x128xf32>
    %14 = tpu.matmul %12, %13, %cst_7 {dimension_numbers = #tpu.dot_dimension_numbers<[1], [0], [0], [1], [0, 0, 1, 1], [], []>} : vector<80x160xbf16>, vector<160x128xbf16>, vector<80x128xf32> -> vector<80x128xf32>
    %c0_8 = arith.constant 0 : index
    %c0_9 = arith.constant 0 : index
    %15 = vector.load %arg4[%c0_8, %c0_9] : memref<1x128xf32, #tpu.memory_space<vmem>>, vector<1x128xf32>
    %16 = vector.broadcast %15 : vector<1x128xf32> to vector<80x128xf32>
    %17 = arith.addf %14, %16 : vector<80x128xf32>
    %18 = arith.negf %17 : vector<80x128xf32>
    %19 = math.exp %18 : vector<80x128xf32>
    %cst_10 = arith.constant 1.000000e+00 : f32
    %20 = vector.broadcast %cst_10 : f32 to vector<80x128xf32>
    %21 = arith.addf %20, %19 : vector<80x128xf32>
    %22 = arith.divf %20, %21 : vector<80x128xf32>
    %23 = tpu.iota {dimensions = array<i32: 1>} : vector<80x128xi32>
    %c96_i32 = arith.constant 96 : i32
    %24 = vector.broadcast %c96_i32 : i32 to vector<80x128xi32>
    %25 = arith.cmpi sge, %23, %24 : vector<80x128xi32>
    %cst_11 = arith.constant 2.000000e+00 : f32
    %26 = vector.broadcast %cst_11 : f32 to vector<80x128xf32>
    %27 = arith.mulf %26, %22 : vector<80x128xf32>
    %cst_12 = arith.constant 1.000000e+00 : f32
    %28 = vector.broadcast %cst_12 : f32 to vector<80x128xf32>
    %29 = arith.subf %27, %28 : vector<80x128xf32>
    %30 = arith.select %25, %29, %22 : vector<80x128xi1>, vector<80x128xf32>
    %31 = vector.extract_strided_slice %30 {offsets = [0, 0], sizes = [80, 32], strides = [1, 1]} : vector<80x128xf32> to vector<80x32xf32>
    %32 = vector.extract_strided_slice %30 {offsets = [0, 32], sizes = [80, 32], strides = [1, 1]} : vector<80x128xf32> to vector<80x32xf32>
    %33 = vector.extract_strided_slice %30 {offsets = [0, 64], sizes = [80, 32], strides = [1, 1]} : vector<80x128xf32> to vector<80x32xf32>
    %34 = vector.extract_strided_slice %30 {offsets = [0, 96], sizes = [80, 32], strides = [1, 1]} : vector<80x128xf32> to vector<80x32xf32>
    %35 = arith.mulf %31, %2 : vector<80x32xf32>
    %36 = arith.mulf %32, %34 : vector<80x32xf32>
    %37 = arith.addf %35, %36 : vector<80x32xf32>
    %38 = math.tanh %37 : vector<80x32xf32>
    %39 = arith.mulf %33, %38 : vector<80x32xf32>
    %40 = tpu.concatenate %39, %37 in 1 : vector<80x32xf32>, vector<80x32xf32> -> vector<80x64xf32>
    %c0_13 = arith.constant 0 : index
    %c0_14 = arith.constant 0 : index
    %41 = vector.load %arg5[%c0_13, %c0_14] : memref<80x64xf32, #tpu.memory_space<vmem>>, vector<80x64xf32>
    tpu.vector_store %arg5[%c0_13, %c0_14], %40 {strides = array<i32>} : memref<80x64xf32, #tpu.memory_space<vmem>>, vector<80x64xf32>,
    return
  }
}

</mosaic_0001>

<bundles_post_ra>
// kernel: glstm_step.1
= control target key start
LH: loop header
LB: loop body
LE: loop exit
PB: predicated region body
PF: predicated region fallthrough
CT: control target
= control target key end

     0   :  { %v1358_v3 = vmov 0.0   ;;  %s1359_s9 = smov 8   ;;  %vm1360_vm0 = vmmov 0   ;;  %vm81_vm1 = vcmask 64512   ;;  %vm202_vm2 = vcmask 654336   ;;  %s1362_s16 = smov 40   ;;  %s1922_s1 = inlined_call_operand.vmem [shape: f32[80,64], index: 1, kind: input, shape index: {}, may-alias: {1,5}]   ;;  %s1923_s2 = inlined_call_operand.vmem [shape: bf16[240,80], index: 2, kind: input, shape index: {}]   ;;  %s1924_s0 = inlined_call_operand.vmem [shape: f32[80,8], index: 0, kind: input, shape index: {}]   ;;  %s1925_s3 = inlined_call_operand.vmem [shape: bf16[160,128], index: 3, kind: input, shape index: {}]   ;;  %s1926_s4 = inlined_call_operand.vmem [shape: f32[1,128], index: 4, kind: input, shape index: {}]   ;;  %s1927_s5 = inlined_call_operand.vmem [shape: f32[80,64], index: 5, kind: output, shape index: {}, may-alias: {1,5}]  }
   0x1   :  { %v1401_v0 = vld [vmem:[%s1922_s1 + $0x40] sm:$0xff]  ;;  %v1406_v1 = vld [vmem:[%s1922_s1 + $0x48] sm:$0xff]  ;;  %v1411_v2 = vld [vmem:[%s1922_s1 + $0x30] sm:$0xff]  ;;  %1158 = vmatprep.subr.bf16.mxu0 %v1358_v3  ;;  %1228 = vmatprep.subr.bf16.mxu1 %v1358_v3  ;;  %s1363_s19 = smov 120   ;;  %s1364_s30 = smov 80   ;;  %vm590_vm3 = vcmask 261120  }
   0x2   :  { %v1248_v4 = vpack.i.bf16 %v1406_v1, %v1401_v0  ;;  %v1420_v5 = vld [vmem:[%s1922_s1 + $0x38] sm:$0xff]  ;;  %v1425_v6 = vld [vmem:[%s1922_s1 + $0x20] sm:$0xff]  ;;  %v1430_v7 = vld [vmem:[%s1922_s1 + $0x28] sm:$0xff]  ;;  %1168 = vmatprep.mubr.msk.bf16.mxu0 %vm1360_vm0, %v1358_v3  ;;  %1208 = vmatprep.mubr.msk.bf16.mxu1 %vm1360_vm0, %v1358_v3  ;;  %vm461_vm4 = vcmask 326656   ;;  %vm487_vm5 = vcmask 982016   ;;  %s1366_s7 = smov 96  }
   0x3   :  { %v1258_v8 = vpack.i.bf16 %v1430_v7, %v1425_v6  ;;  %v1437_v9 = vld [vmem:[%s1922_s1 + $0x10] sm:$0xff]  ;;  %v1442_v10 = vld [vmem:[%s1922_s1 + $0x18] sm:$0xff]  ;;  %v1253_v11 = vpack.i.bf16 %v1420_v5, %v1411_v2  ;;  %v1451_v13 = vld [vmem:[%s1922_s1] sm:$0xff]  ;;  %vm1057_vm7 = vcmask 523264  }
   0x4   :  { %1249 = vrot.lane.b32.xlu0 %v1248_v4, %s1359_s9  ;;  %v1263_v12 = vpack.i.bf16 %v1442_v10, %v1437_v9  ;;  %v1456_v14 = vld [vmem:[%s1922_s1 + $0x8] sm:$0xff]  ;;  %v39_v17 = vld [vmem:[%s1924_s0 + $0x40] sm:$0xff]  ;;  %v37_v30 = vld [vmem:[%s1924_s0 + $0x30] sm:$0xff] }
   0x5   :  { %1259 = vrot.lane.b32.xlu1 %v1258_v8, %s1359_s9  ;;  %v1268_v15 = vpack.i.bf16 %v1456_v14, %v1451_v13  ;;  %v40_v18 = vld [vmem:[%s1924_s0 + $0x48] sm:$0xff]  ;;  %v35_v26 = vld [vmem:[%s1924_s0 + $0x20] sm:$0xff]  ;;  %v38_v31 = vld [vmem:[%s1924_s0 + $0x38] sm:$0xff] }
   0x6   :  { %v36_v27 = vld [vmem:[%s1924_s0 + $0x28] sm:$0xff]  ;;  %v33_v43 = vld [vmem:[%s1924_s0 + $0x10] sm:$0xff]  ;;  %v34_v44 = vld [vmem:[%s1924_s0 + $0x18] sm:$0xff] }
   0x7   :  { %v31_v50 = vld [vmem:[%s1924_s0] sm:$0xff]  ;;  %v32_v51 = vld [vmem:[%s1924_s0 + $0x8] sm:$0xff]  ;;  %v1278_v57 = vld [vmem:[%s1923_s2 + $0x50] sm:$0xff]   ;;  %s1367_s0 = smov 32  }
   0x8   :  { %1254 = vrot.lane.b32.xlu0 %v1253_v11, %s1359_s9  ;;  %v1273_v56 = vld [vmem:[%s1923_s2] sm:$0xff]   ;;  %v1274_v58 = vld [vmem:[%s1923_s2 + $0x8] sm:$0xff]   ;;  %v1280_v59 = vld [vmem:[%s1923_s2 + $0x58] sm:$0xff]  }
   0x9   :  { %1264 = vrot.lane.b32.xlu1 %v1263_v12, %s1359_s9  ;;  %v1275_v60 = vld [vmem:[%s1923_s2 + $0x10] sm:$0xff]   ;;  %v1282_v61 = vld [vmem:[%s1923_s2 + $0x60] sm:$0xff]   ;;  %v1276_v62 = vld [vmem:[%s1923_s2 + $0x18] sm:$0xff]  }
   0xa   :  { %v1284_v63 = vld [vmem:[%s1923_s2 + $0x68] sm:$0xff]   ;;  %v1277_v4 = vld [vmem:[%s1923_s2 + $0x20] sm:$0xff]   ;;  %v1286_v8 = vld [vmem:[%s1923_s2 + $0x70] sm:$0xff]  }
   0xb   :  { %v1279_v11 = vld [vmem:[%s1923_s2 + $0x28] sm:$0xff]   ;;  %v1281_v12 = vld [vmem:[%s1923_s2 + $0x30] sm:$0xff]  }
   0xc   :  { %1269 = vrot.lane.b32.xlu0 %v1268_v15, %s1359_s9  ;;  %v1283_v15 = vld [vmem:[%s1923_s2 + $0x38] sm:$0xff]  }
  0x76   :  { %v1250_v16 = vpop.permute.xlu0 %1249 }
  0x77   :  { %v1252_v19 = vunpack.i.h.bf16 %v1250_v16  ;;  %v1251_v20 = vunpack.i.l.bf16 %v1250_v16  ;;  %v1260_v21 = vpop.permute.xlu1 %1259  ;;  %v1285_v16 = vld [vmem:[%s1923_s2 + $0x40] sm:$0xff]  }
  0x78   :  { %v1262_v22 = vunpack.i.h.bf16 %v1260_v21  ;;  %v1261_v23 = vunpack.i.l.bf16 %v1260_v21 }
  0x79   :  { %v90_v24 = vsel %vm81_vm1, %v39_v17, %v1251_v20  ;;  %v91_v25 = vsel %vm81_vm1, %v40_v18, %v1252_v19  ;;  %v1287_v17 = vld [vmem:[%s1923_s2 + $0x48] sm:$0xff]   ;;  %v1361_v18 = vmov 0   ;;  %v1288_v19 = vld [vmem:[%s1925_s3 + $0x38] sm:$0xff]   ;;  %v1289_v20 = vld [vmem:[%s1925_s3 + $0x30] sm:$0xff]  }
  0x7a   :  { %v1255_v28 = vpop.permute.xlu0 %1254  ;;  %v1478_v29 = vpack.c.bf16 %v91_v25, %v90_v24  ;;  %v86_v35 = vsel %vm81_vm1, %v35_v26, %v1261_v23  ;;  %v87_v36 = vsel %vm81_vm1, %v36_v27, %v1262_v22  ;;  %v1290_v22 = vld [vmem:[%s1925_s3 + $0x28] sm:$0xff]  }
  0x7b   :  { %v1257_v32 = vunpack.i.h.bf16 %v1255_v28  ;;  %v1256_v33 = vunpack.i.l.bf16 %v1255_v28  ;;  %v1265_v34 = vpop.permute.xlu1 %1264  ;;  %v1504_v45 = vpack.c.bf16 %v87_v36, %v86_v35  ;;  %v1291_v28 = vld [vmem:[%s1925_s3 + $0x20] sm:$0xff]   ;;  %v1292_v35 = vld [vmem:[%s1925_s3 + $0x18] sm:$0xff]  }
  0x7c   :  { %1159 = vmatpush3.bf16.msra.mxu0 %v1478_v29  ;;  %1233 = vmatpush3.bf16.msra.mxu1 %v1478_v29  ;;  %v1267_v39 = vunpack.i.h.bf16 %v1265_v34  ;;  %v1266_v40 = vunpack.i.l.bf16 %v1265_v34 }
  0x7d   :  { %1160 = vmatprep.subr.bf16.mxu0 %v1358_v3  ;;  %1229 = vmatprep.subr.bf16.mxu1 %v1358_v3  ;;  %v88_v37 = vsel %vm81_vm1, %v37_v30, %v1256_v33  ;;  %v89_v38 = vsel %vm81_vm1, %v38_v31, %v1257_v32 }
  0x7e   :  { %v1494_v41 = vpack.c.bf16 %v89_v38, %v88_v37  ;;  %v1270_v42 = vpop.permute.xlu0 %1269  ;;  %v84_v48 = vsel %vm81_vm1, %v33_v43, %v1266_v40  ;;  %v85_v49 = vsel %vm81_vm1, %v34_v44, %v1267_v39  ;;  %v1293_v40 = vld [vmem:[%s1925_s3 + $0x10] sm:$0xff]  }
  0x7f   :  { %v1272_v46 = vunpack.i.h.bf16 %v1270_v42  ;;  %v1271_v47 = vunpack.i.l.bf16 %v1270_v42  ;;  %v1518_v52 = vpack.c.bf16 %v85_v49, %v84_v48 }
  0x80   :  { %1161 = vmatpush3.bf16.msra.mxu0 %v1494_v41  ;;  %1234 = vmatpush3.bf16.msra.mxu1 %v1494_v41 }
  0x81   :  { %1162 = vmatprep.subr.bf16.mxu0 %v1358_v3  ;;  %1230 = vmatprep.subr.bf16.mxu1 %v1358_v3  ;;  %v82_v53 = vsel %vm81_vm1, %v31_v50, %v1271_v47  ;;  %v83_v54 = vsel %vm81_vm1, %v32_v51, %v1272_v46  ;;  %v1294_v47 = vld [vmem:[%s1925_s3 + $0x8] sm:$0xff]  }
  0x82   :  { %v1526_v55 = vpack.c.bf16 %v83_v54, %v82_v53  ;;  %v1295_v53 = vld [vmem:[%s1925_s3] sm:$0xff]  }
  0x84   :  { %1163 = vmatpush3.bf16.msra.mxu0 %v1504_v45  ;;  %1235 = vmatpush3.bf16.msra.mxu1 %v1504_v45 }
  0x85   :  { %1164 = vmatprep.subr.bf16.mxu0 %v1358_v3  ;;  %1231 = vmatprep.subr.bf16.mxu1 %v1358_v3 }
  0x88   :  { %1165 = vmatpush3.bf16.msra.mxu0 %v1518_v52  ;;  %1236 = vmatpush3.bf16.msra.mxu1 %v1518_v52 }
  0x89   :  { %1166 = vmatprep.subr.bf16.mxu0 %v1358_v3  ;;  %1232 = vmatprep.subr.bf16.mxu1 %v1358_v3 }
  0x8c   :  { %1167 = vmatpush3.bf16.msra.mxu0 %v1526_v55  ;;  %1237 = vmatpush3.bf16.msra.mxu1 %v1526_v55 }
  0x8d   :  { %601 = vmatprep.subr.bf16.mxu1 %v1361_v18 }
  0x8f   :  { %1169 = vmatmul.mubr.msk.bf16.vlgmr.msra.gmra.mxu0 %vm202_vm2, %v1273_v56  ;;  %1209 = vmatmul.mubr.msk.bf16.vlgmr.msra.gmra.mxu1 %vm202_vm2, %v1278_v57 }
  0x90   :  { %1172 = vmatprep.mubr.msk.bf16.mxu0 %vm1360_vm0, %v1358_v3  ;;  %1212 = vmatprep.mubr.msk.bf16.mxu1 %vm1360_vm0, %v1358_v3 }
  0x91   :  { %602 = vmatpush1.bf16.msra.mxu1 %v1288_v19 }
  0x92   :  { %603 = vmatprep.subr.bf16.mxu1 %v1361_v18 }
  0x95   :  { %604 = vmatpush1.bf16.msra.mxu1 %v1289_v20 }
  0x96   :  { %605 = vmatprep.subr.bf16.mxu1 %v1361_v18 }
  0x97   :  { %1173 = vmatmul.mubr.msk.bf16.gmra.mxu0 %vm202_vm2, %v1274_v58  ;;  %1213 = vmatmul.mubr.msk.bf16.gmra.mxu1 %vm202_vm2, %v1280_v59  ;;  %v1296_v59 = vld [vmem:[%s1925_s3 + $0x48] sm:$0xff]  }
  0x98   :  { %1176 = vmatprep.mubr.msk.bf16.mxu0 %vm1360_vm0, %v1358_v3  ;;  %1216 = vmatprep.mubr.msk.bf16.mxu1 %vm1360_vm0, %v1358_v3 }
  0x99   :  { %606 = vmatpush1.bf16.msra.mxu1 %v1290_v22 }
  0x9a   :  { %607 = vmatprep.subr.bf16.mxu1 %v1361_v18 }
  0x9d   :  { %608 = vmatpush1.bf16.msra.mxu1 %v1291_v28 }
  0x9e   :  { %609 = vmatprep.subr.bf16.mxu1 %v1361_v18 }
  0x9f   :  { %1177 = vmatmul.mubr.msk.bf16.gmra.mxu0 %vm202_vm2, %v1275_v60  ;;  %1217 = vmatmul.mubr.msk.bf16.gmra.mxu1 %vm202_vm2, %v1282_v61 }
  0xa0   :  { %1180 = vmatprep.mubr.msk.bf16.mxu0 %vm1360_vm0, %v1358_v3  ;;  %1220 = vmatprep.mubr.msk.bf16.mxu1 %vm1360_vm0, %v1358_v3 }
  0xa1   :  { %610 = vmatpush1.bf16.msra.mxu1 %v1292_v35 }
  0xa2   :  { %611 = vmatprep.subr.bf16.mxu1 %v1361_v18 }
  0xa5   :  { %612 = vmatpush1.bf16.msra.mxu1 %v1293_v40 }
  0xa6   :  { %613 = vmatprep.subr.bf16.mxu1 %v1361_v18 }
  0xa7   :  { %1181 = vmatmul.mubr.msk.bf16.gmra.mxu0 %vm202_vm2, %v1276_v62  ;;  %1221 = vmatmul.mubr.msk.bf16.gmra.mxu1 %vm202_vm2, %v1284_v63 }
  0xa8   :  { %1184 = vmatprep.mubr.msk.bf16.mxu0 %vm1360_vm0, %v1358_v3  ;;  %1224 = vmatprep.mubr.msk.bf16.mxu1 %vm1360_vm0, %v1358_v3 }
  0xa9   :  { %614 = vmatpush1.bf16.msra.mxu1 %v1294_v47 }
  0xaa   :  { %615 = vmatprep.subr.bf16.mxu1 %v1361_v18 }
  0xad   :  { %616 = vmatpush1.bf16.msra.mxu1 %v1295_v53 }
  0xae   :  { %629 = vmatprep.subr.bf16.mxu1 %v1361_v18 }
  0xaf   :  { %1185 = vmatmul.mubr.msk.bf16.gmra.mxu0 %vm202_vm2, %v1277_v4  ;;  %1225 = vmatmul.mubr.msk.bf16.gmra.mxu1 %vm202_vm2, %v1286_v8  ;;  %v1297_v4 = vld [vmem:[%s1925_s3 + $0x40] sm:$0xff]  }
  0xb0   :  { %1188 = vmatprep.mubr.msk.bf16.mxu0 %vm1360_vm0, %v1358_v3 }
  0xb1   :  { %630 = vmatpush2.bf16.msra.mxu1 %v1296_v59 }
  0xb2   :  { %631 = vmatprep.subr.bf16.mxu1 %v1361_v18 }
  0xb5   :  { %632 = vmatpush2.bf16.msra.mxu1 %v1297_v4 }
  0xb7   :  { %1189 = vmatmul.mubr.msk.bf16.gmra.mxu0 %vm202_vm2, %v1279_v11 }
  0xb8   :  { %1192 = vmatprep.mubr.msk.bf16.mxu0 %vm1360_vm0, %v1358_v3 }
  0xbf   :  { %1193 = vmatmul.mubr.msk.bf16.gmra.mxu0 %vm202_vm2, %v1281_v12 }
  0xc0   :  { %1196 = vmatprep.mubr.msk.bf16.mxu0 %vm1360_vm0, %v1358_v3 }
  0xc7   :  { %1197 = vmatmul.mubr.msk.bf16.gmra.mxu0 %vm202_vm2, %v1283_v15 }
  0xc8   :  { %1200 = vmatprep.mubr.msk.bf16.mxu0 %vm1360_vm0, %v1358_v3 }
  0xcf   :  { %1201 = vmatmul.mubr.msk.bf16.gmra.mxu0 %vm202_vm2, %v1285_v16 }
  0xd0   :  { %1204 = vmatprep.mubr.msk.bf16.mxu0 %vm1360_vm0, %v1358_v3 }
  0xd7   :  { %1205 = vmatmul.mubr.msk.bf16.gmra.mxu0 %vm202_vm2, %v1287_v17 }
 0x14f   :  { %v282_v3 = vpop.f32.mrf.mxu0  ;;  %v362_v21 = vpop.f32.mrf.mxu1 }
 0x151   :  { %v1170_v23 = vpop.f32.mrf.mxu0  ;;  %v1210_v24 = vpop.f32.mrf.mxu1 }
 0x153   :  { %v285_v25 = vpop.f32.mrf.mxu0  ;;  %v365_v26 = vpop.f32.mrf.mxu1 }
 0x154   :  { %v401_v27 = vpack.c.bf16 %v285_v25, %v282_v3  ;;  %v411_v32 = vpack.c.bf16 %v365_v26, %v362_v21 }
 0x155   :  { %v1171_v30 = vpop.f32.mrf.mxu0  ;;  %v1211_v31 = vpop.f32.mrf.mxu1 }
 0x156   :  { %421 = vrot.lane.b32.xlu1 %v401_v27, %s1362_s16 }
 0x157   :  { %v1635_v33 = vpop.f32.mrf.mxu0  ;;  %v1637_v34 = vpop.f32.mrf.mxu1 }
 0x159   :  { %v1174_v36 = vpop.f32.mrf.mxu0  ;;  %v1214_v37 = vpop.f32.mrf.mxu1 }
 0x15a   :  { %451 = vrot.lane.b32.xlu1 %v411_v32, %s1363_s19 }
 0x15b   :  { %v293_v38 = vpop.f32.mrf.mxu0  ;;  %v373_v39 = vpop.f32.mrf.mxu1 }
 0x15c   :  { %v402_v18 = vpack.c.bf16 %v293_v38, %v1635_v33  ;;  %v412_v31 = vpack.c.bf16 %v373_v39, %v1637_v34 }
 0x15d   :  { %v1175_v42 = vpop.f32.mrf.mxu0  ;;  %v1215_v43 = vpop.f32.mrf.mxu1 }
 0x15f   :  { %v298_v44 = vpop.f32.mrf.mxu0  ;;  %v378_v46 = vpop.f32.mrf.mxu1 }
 0x161   :  { %v1178_v48 = vpop.f32.mrf.mxu0  ;;  %v1218_v49 = vpop.f32.mrf.mxu1 }
 0x163   :  { %v301_v50 = vpop.f32.mrf.mxu0  ;;  %v381_v51 = vpop.f32.mrf.mxu1 }
 0x164   :  { %v403_v37 = vpack.c.bf16 %v301_v50, %v298_v44  ;;  %v413_v43 = vpack.c.bf16 %v381_v51, %v378_v46 }
 0x165   :  { %v1179_v54 = vpop.f32.mrf.mxu0  ;;  %v1219_v56 = vpop.f32.mrf.mxu1 }
 0x167   :  { %v306_v57 = vpop.f32.mrf.mxu0  ;;  %v386_v58 = vpop.f32.mrf.mxu1 }
 0x169   :  { %v1182_v60 = vpop.f32.mrf.mxu0  ;;  %v1222_v61 = vpop.f32.mrf.mxu1 }
 0x16b   :  { %v309_v62 = vpop.f32.mrf.mxu0  ;;  %v389_v63 = vpop.f32.mrf.mxu1 }
 0x16c   :  { %v404_v39 = vpack.c.bf16 %v309_v62, %v306_v57  ;;  %v414_v49 = vpack.c.bf16 %v389_v63, %v386_v58 }
 0x16d   :  { %v1183_v8 = vpop.f32.mrf.mxu0  ;;  %v1223_v11 = vpop.f32.mrf.mxu1 }
 0x16f   :  { %v314_v12 = vpop.f32.mrf.mxu0  ;;  %v394_v15 = vpop.f32.mrf.mxu1 }
 0x171   :  { %v1186_v16 = vpop.f32.mrf.mxu0  ;;  %v1226_v17 = vpop.f32.mrf.mxu1 }
 0x173   :  { %v317_v19 = vpop.f32.mrf.mxu0  ;;  %v397_v20 = vpop.f32.mrf.mxu1 }
 0x174   :  { %v405_v50 = vpack.c.bf16 %v317_v19, %v314_v12  ;;  %v415_v56 = vpack.c.bf16 %v397_v20, %v394_v15 }
 0x175   :  { %v1187_v3 = vpop.f32.mrf.mxu0  ;;  %v1227_v21 = vpop.f32.mrf.mxu1 }
 0x177   :  { %v322_v22 = vpop.f32.mrf.mxu0 }
 0x179   :  { %v1190_v23 = vpop.f32.mrf.mxu0 }
 0x17b   :  { %v325_v24 = vpop.f32.mrf.mxu0 }
 0x17c   :  { %v406_v25 = vpack.c.bf16 %v325_v24, %v322_v22 }
 0x17d   :  { %v1191_v26 = vpop.f32.mrf.mxu0 }
 0x17e   :  { %436 = vrot.lane.b32.xlu0 %v406_v25, %s1364_s30 }
 0x17f   :  { %v330_v27 = vpop.f32.mrf.mxu0 }
 0x181   :  { %v1194_v28 = vpop.f32.mrf.mxu0 }
 0x182   :  { %423 = vrot.lane.b32.xlu0 %v402_v18, %s1362_s16 }
 0x183   :  { %v333_v30 = vpop.f32.mrf.mxu0 }
 0x184   :  { %v407_v32 = vpack.c.bf16 %v333_v30, %v330_v27 }
 0x185   :  { %v1195_v35 = vpop.f32.mrf.mxu0 }
 0x186   :  { %453 = vrot.lane.b32.xlu0 %v412_v31, %s1363_s19  ;;  %438 = vrot.lane.b32.xlu1 %v407_v32, %s1364_s30  ;;  %v1707_v32 = vld [vmem:[%s1926_s4] ss:$0 sm:$0xff]  ;;  %s1365_s4 = smov 64  }
 0x187   :  { %v338_v36 = vpop.f32.mrf.mxu0 }
 0x189   :  { %v1198_v40 = vpop.f32.mrf.mxu0 }
 0x18a   :  { %425 = vrot.lane.b32.xlu1 %v403_v37, %s1362_s16 }
 0x18b   :  { %v341_v42 = vpop.f32.mrf.mxu0 }
 0x18c   :  { %v408_v33 = vpack.c.bf16 %v341_v42, %v338_v36 }
 0x18d   :  { %v1199_v38 = vpop.f32.mrf.mxu0 }
 0x18e   :  { %455 = vrot.lane.b32.xlu1 %v413_v43, %s1363_s19  ;;  %440 = vrot.lane.b32.xlu0 %v408_v33, %s1364_s30 }
 0x18f   :  { %v346_v34 = vpop.f32.mrf.mxu0 }
 0x191   :  { %v1202_v47 = vpop.f32.mrf.mxu0 }
 0x192   :  { %427 = vrot.lane.b32.xlu0 %v404_v39, %s1362_s16 }
 0x193   :  { %v349_v48 = vpop.f32.mrf.mxu0 }
 0x194   :  { %v409_v53 = vpack.c.bf16 %v349_v48, %v346_v34 }
 0x195   :  { %v1203_v44 = vpop.f32.mrf.mxu0 }
 0x196   :  { %457 = vrot.lane.b32.xlu0 %v414_v49, %s1363_s19  ;;  %442 = vrot.lane.b32.xlu1 %v409_v53, %s1364_s30 }
 0x197   :  { %v354_v46 = vpop.f32.mrf.mxu0 }
 0x199   :  { %v1206_v51 = vpop.f32.mrf.mxu0 }
 0x19a   :  { %429 = vrot.lane.b32.xlu1 %v405_v50, %s1362_s16 }
 0x19b   :  { %v357_v54 = vpop.f32.mrf.mxu0 }
 0x19c   :  { %v410_v59 = vpack.c.bf16 %v357_v54, %v354_v46 }
 0x19d   :  { %v1207_v57 = vpop.f32.mrf.mxu0 }
 0x19e   :  { %459 = vrot.lane.b32.xlu1 %v415_v56, %s1363_s19  ;;  %444 = vrot.lane.b32.xlu0 %v410_v59, %s1364_s30 }
 0x1c8   :  { %v422_v58 = vpop.permute.xlu1 %421 }
 0x1c9   :  { %v464_v61 = vsel %vm461_vm4, %v1526_v55, %v422_v58 }
 0x1cc   :  { %v452_v60 = vpop.permute.xlu1 %451 }
 0x1cd   :  { %1113 = vmatprep.mubr.msk.bf16.mxu1 %vm590_vm3, %v452_v60 }
 0x1f0   :  { %v437_v62 = vpop.permute.xlu0 %436 }
 0x1f1   :  { %v478_v63 = vsel %vm202_vm2, %v464_v61, %v437_v62 }
 0x1f2   :  { %v489_v4 = vsel %vm487_vm5, %v478_v63, %v452_v60 }
 0x1f3   :  { %634 = vmatmul.mubr.bf16.vlgmr.msra.gmra.mxu1 %v489_v4 }
 0x1f4   :  { %v424_v8 = vpop.permute.xlu0 %423 }
 0x1f5   :  { %v467_v11 = vsel %vm461_vm4, %v1518_v52, %v424_v8 }
 0x1f8   :  { %v454_v12 = vpop.permute.xlu0 %453  ;;  %v439_v15 = vpop.permute.xlu1 %438 }
 0x1f9   :  { %v480_v16 = vsel %vm202_vm2, %v467_v11, %v439_v15  ;;  %1114 = vmatprep.mubr.msk.bf16.mxu1 %vm590_vm3, %v454_v12 }
 0x1fa   :  { %v492_v17 = vsel %vm487_vm5, %v480_v16, %v454_v12 }
 0x1fb   :  { %642 = vmatmul.mubr.bf16.gmra.mxu1 %v492_v17 }
 0x1fc   :  { %v426_v55 = vpop.permute.xlu1 %425 }
 0x1fd   :  { %v470_v19 = vsel %vm461_vm4, %v1504_v45, %v426_v55  ;;  %v734_v55 = vlaneseq }
 0x200   :  { %v456_v20 = vpop.permute.xlu1 %455  ;;  %v441_v3 = vpop.permute.xlu0 %440 }
 0x201   :  { %v482_v21 = vsel %vm202_vm2, %v470_v19, %v441_v3  ;;  %1115 = vmatprep.mubr.msk.bf16.mxu1 %vm590_vm3, %v456_v20 }
 0x202   :  { %v495_v52 = vsel %vm487_vm5, %v482_v21, %v456_v20 }
 0x203   :  { %650 = vmatmul.mubr.bf16.gmra.mxu1 %v495_v52 }
 0x204   :  { %v428_v22 = vpop.permute.xlu0 %427 }
 0x205   :  { %v473_v23 = vsel %vm461_vm4, %v1494_v41, %v428_v22 }
 0x208   :  { %v458_v24 = vpop.permute.xlu0 %457  ;;  %v443_v25 = vpop.permute.xlu1 %442 }
 0x209   :  { %v484_v26 = vsel %vm202_vm2, %v473_v23, %v443_v25  ;;  %1116 = vmatprep.mubr.msk.bf16.mxu1 %vm590_vm3, %v458_v24  ;;  %v1717_v23 = vand.u32 127, %v734_v55 }
 0x20a   :  { %v498_v45 = vsel %vm487_vm5, %v484_v26, %v458_v24 }
 0x20b   :  { %658 = vmatmul.mubr.bf16.gmra.mxu1 %v498_v45  ;;  %vm736_vm6 = vcmp.ge.s32.totalorder %v1717_v23, 96 }
 0x20c   :  { %v430_v27 = vpop.permute.xlu1 %429 }
 0x20d   :  { %v476_v18 = vsel %vm461_vm4, %v1478_v29, %v430_v27 }
 0x210   :  { %v460_v28 = vpop.permute.xlu1 %459  ;;  %v445_v30 = vpop.permute.xlu0 %444 }
 0x211   :  { %v486_v31 = vsel %vm202_vm2, %v476_v18, %v445_v30  ;;  %1117 = vmatprep.mubr.msk.bf16.mxu1 %vm590_vm3, %v460_v28 }
 0x212   :  { %v501_v41 = vsel %vm487_vm5, %v486_v31, %v460_v28 }
 0x213   :  { %666 = vmatmul.mubr.bf16.gmra.mxu1 %v501_v41 }
 0x2b3   :  { %v635_v35 = vpop.f32.mrf.mxu1 }
 0x2b4   :  { %v636_v36 = vadd.f32 %v1707_v32, %v635_v35 }
 0x2b5   :  { %v637_v37 = vpop.f32.mrf.mxu1 }
 0x2b6   :  { %v1118_v40 = vmul.f32 -1.442695, %v636_v36 }
 0x2b7   :  { %v638_v29 = vpop.f32.mrf.mxu1 }
 0x2b8   :  { %1298 = vpow2.f32 %v1118_v40  ;;  %v639_v42 = vadd.f32 %v1707_v32, %v638_v29 }
 0x2b9   :  { %v640_v43 = vpop.f32.mrf.mxu1 }
 0x2ba   :  { %v1119_v33 = vmul.f32 -1.442695, %v639_v42 }
 0x2bb   :  { %v643_v38 = vpop.f32.mrf.mxu1 }
 0x2bc   :  { %1300 = vpow2.f32 %v1119_v33  ;;  %v644_v34 = vadd.f32 %v1707_v32, %v643_v38 }
 0x2bd   :  { %v645_v39 = vpop.f32.mrf.mxu1 }
 0x2be   :  { %v1120_v47 = vmul.f32 -1.442695, %v644_v34 }
 0x2bf   :  { %v646_v48 = vpop.f32.mrf.mxu1 }
 0x2c0   :  { %1302 = vpow2.f32 %v1120_v47  ;;  %v647_v49 = vadd.f32 %v1707_v32, %v646_v48 }
 0x2c1   :  { %v648_v53 = vpop.f32.mrf.mxu1 }
 0x2c2   :  { %v1121_v44 = vmul.f32 -1.442695, %v647_v49 }
 0x2c3   :  { %v651_v46 = vpop.f32.mrf.mxu1 }
 0x2c4   :  { %1304 = vpow2.f32 %v1121_v44  ;;  %v652_v50 = vadd.f32 %v1707_v32, %v651_v46 }
 0x2c5   :  { %v1299_v51 = vpop.eup %1298  ;;  %v653_v54 = vpop.f32.mrf.mxu1 }
 0x2c6   :  { %v704_v56 = vadd.f32 1.0, %v1299_v51  ;;  %v1122_v59 = vmul.f32 -1.442695, %v652_v50 }
 0x2c7   :  { %v654_v57 = vpop.f32.mrf.mxu1 }
 0x2c8   :  { %1306 = vrcp.f32 %v704_v56  ;;  %v655_v58 = vadd.f32 %v1707_v32, %v654_v57 }
 0x2c9   :  { %v1301_v60 = vpop.eup %1300  ;;  %1308 = vpow2.f32 %v1122_v59  ;;  %v656_v61 = vpop.f32.mrf.mxu1 }
 0x2ca   :  { %v705_v62 = vadd.f32 1.0, %v1301_v60  ;;  %v1123_v63 = vmul.f32 -1.442695, %v655_v58 }
 0x2cb   :  { %v659_v4 = vpop.f32.mrf.mxu1 }
 0x2cc   :  { %1310 = vrcp.f32 %v705_v62  ;;  %v660_v8 = vadd.f32 %v1707_v32, %v659_v4 }
 0x2cd   :  { %v1303_v11 = vpop.eup %1302  ;;  %1312 = vpow2.f32 %v1123_v63  ;;  %v661_v12 = vpop.f32.mrf.mxu1 }
 0x2ce   :  { %v706_v15 = vadd.f32 1.0, %v1303_v11  ;;  %v1124_v16 = vmul.f32 -1.442695, %v660_v8 }
 0x2cf   :  { %v662_v17 = vpop.f32.mrf.mxu1 }
 0x2d0   :  { %1314 = vrcp.f32 %v706_v15  ;;  %v663_v19 = vadd.f32 %v1707_v32, %v662_v17 }
 0x2d1   :  { %v1305_v20 = vpop.eup %1304  ;;  %1316 = vpow2.f32 %v1124_v16  ;;  %v664_v3 = vpop.f32.mrf.mxu1 }
 0x2d2   :  { %v707_v21 = vadd.f32 1.0, %v1305_v20  ;;  %v1125_v52 = vmul.f32 -1.442695, %v663_v19 }
 0x2d3   :  { %v667_v22 = vpop.f32.mrf.mxu1 }
 0x2d4   :  { %1318 = vrcp.f32 %v707_v21  ;;  %v668_v24 = vadd.f32 %v1707_v32, %v667_v22 }
 0x2d5   :  { %v1307_v25 = vpop.eup %1306  ;;  %1320 = vpow2.f32 %v1125_v52  ;;  %v669_v26 = vpop.f32.mrf.mxu1 }
 0x2d6   :  { %v1309_v45 = vpop.eup %1308  ;;  %v1126_v27 = vmul.f32 -1.442695, %v668_v24  ;;  %v737_v18 = vmul.f32 2.0, %v1307_v25 }
 0x2d7   :  { %v708_v28 = vadd.f32 1.0, %v1309_v45  ;;  %v670_v30 = vpop.f32.mrf.mxu1 }
 0x2d8   :  { %1322 = vpow2.f32 %v1126_v27  ;;  %v671_v31 = vadd.f32 %v1707_v32, %v670_v30  ;;  %v1128_v41 = vadd.f32 -1.0, %v737_v18 }
 0x2d9   :  { %v1311_v35 = vpop.eup %1310  ;;  %1324 = vrcp.f32 %v708_v28  ;;  %v672_v36 = vpop.f32.mrf.mxu1 }
 0x2da   :  { %v1313_v37 = vpop.eup %1312  ;;  %v1127_v40 = vmul.f32 -1.442695, %v671_v31  ;;  %v1724_v29 = vsel %vm736_vm6, %v1128_v41, %v1307_v25  ;;  %v738_v42 = vmul.f32 2.0, %v1311_v35 }
 0x2db   :  { %v709_v43 = vadd.f32 1.0, %v1313_v37  ;;  %817 = vrot.lane.b32.xlu0 %v1724_v29, %s1365_s4 }
 0x2dc   :  { %1326 = vpow2.f32 %v1127_v40  ;;  %v1129_v33 = vadd.f32 -1.0, %v738_v42 }
 0x2dd   :  { %v1315_v38 = vpop.eup %1314  ;;  %1328 = vrcp.f32 %v709_v43 }
 0x2de   :  { %v1317_v32 = vpop.eup %1316  ;;  %v1730_v34 = vsel %vm736_vm6, %v1129_v33, %v1311_v35  ;;  %v739_v39 = vmul.f32 2.0, %v1315_v38 }
 0x2df   :  { %v710_v47 = vadd.f32 1.0, %v1317_v32  ;;  %819 = vrot.lane.b32.xlu1 %v1730_v34, %s1365_s4 }
 0x2e0   :  { %v1130_v48 = vadd.f32 -1.0, %v739_v39 }
 0x2e1   :  { %v1319_v49 = vpop.eup %1318  ;;  %1330 = vrcp.f32 %v710_v47 }
 0x2e2   :  { %v1321_v53 = vpop.eup %1320  ;;  %v1736_v44 = vsel %vm736_vm6, %v1130_v48, %v1315_v38  ;;  %v740_v46 = vmul.f32 2.0, %v1319_v49 }
 0x2e3   :  { %v711_v50 = vadd.f32 1.0, %v1321_v53  ;;  %821 = vrot.lane.b32.xlu0 %v1736_v44, %s1365_s4 }
 0x2e4   :  { %v1131_v51 = vadd.f32 -1.0, %v740_v46 }
 0x2e5   :  { %v1323_v54 = vpop.eup %1322  ;;  %1332 = vrcp.f32 %v711_v50 }
 0x2e6   :  { %v1325_v56 = vpop.eup %1324  ;;  %v712_v59 = vadd.f32 1.0, %v1323_v54  ;;  %v1742_v57 = vsel %vm736_vm6, %v1131_v51, %v1319_v49 }
 0x2e7   :  { %823 = vrot.lane.b32.xlu1 %v1742_v57, %s1365_s4  ;;  %v741_v58 = vmul.f32 2.0, %v1325_v56 }
 0x2e8   :  { %1334 = vrcp.f32 %v712_v59 }
 0x2e9   :  { %v1327_v60 = vpop.eup %1326  ;;  %v1132_v61 = vadd.f32 -1.0, %v741_v58 }
 0x2ea   :  { %v1329_v62 = vpop.eup %1328  ;;  %v713_v63 = vadd.f32 1.0, %v1327_v60 }
 0x2eb   :  { %v1748_v4 = vsel %vm736_vm6, %v1132_v61, %v1325_v56  ;;  %v742_v8 = vmul.f32 2.0, %v1329_v62 }
 0x2ec   :  { %1336 = vrcp.f32 %v713_v63  ;;  %825 = vrot.lane.b32.xlu0 %v1748_v4, %s1365_s4 }
 0x2ed   :  { %v1133_v11 = vadd.f32 -1.0, %v742_v8 }
 0x2ee   :  { %v1331_v12 = vpop.eup %1330 }
 0x2ef   :  { %v1754_v15 = vsel %vm736_vm6, %v1133_v11, %v1329_v62  ;;  %v743_v16 = vmul.f32 2.0, %v1331_v12 }
 0x2f0   :  { %827 = vrot.lane.b32.xlu1 %v1754_v15, %s1365_s4 }
 0x2f1   :  { %v1134_v17 = vadd.f32 -1.0, %v743_v16 }
 0x2f2   :  { %v1333_v55 = vpop.eup %1332 }
 0x2f3   :  { %v1760_v19 = vsel %vm736_vm6, %v1134_v17, %v1331_v12  ;;  %v744_v20 = vmul.f32 2.0, %v1333_v55 }
 0x2f4   :  { %829 = vrot.lane.b32.xlu0 %v1760_v19, %s1365_s4 }
 0x2f5   :  { %v1335_v3 = vpop.eup %1334  ;;  %v1135_v21 = vadd.f32 -1.0, %v744_v20 }
 0x2f6   :  { %v745_v52 = vmul.f32 2.0, %v1335_v3 }
 0x2f7   :  { %v1766_v22 = vsel %vm736_vm6, %v1135_v21, %v1333_v55 }
 0x2f8   :  { %831 = vrot.lane.b32.xlu1 %v1766_v22, %s1365_s4  ;;  %v1136_v24 = vadd.f32 -1.0, %v745_v52 }
 0x2f9   :  { %v1337_v25 = vpop.eup %1336 }
 0x2fa   :  { %v1772_v26 = vsel %vm736_vm6, %v1136_v24, %v1335_v3  ;;  %v746_v45 = vmul.f32 2.0, %v1337_v25 }
 0x2fb   :  { %833 = vrot.lane.b32.xlu0 %v1772_v26, %s1365_s4 }
 0x2fc   :  { %v1137_v27 = vadd.f32 -1.0, %v746_v45 }
 0x2fe   :  { %v1778_v18 = vsel %vm736_vm6, %v1137_v27, %v1337_v25 }
 0x2ff   :  { %835 = vrot.lane.b32.xlu1 %v1778_v18, %s1365_s4  ;;  %767 = vrot.lane.b32.xlu0 %v1451_v13, %s1366_s7 }
 0x303   :  { %769 = vrot.lane.b32.xlu1 %v1456_v14, %s1366_s7  ;;  %771 = vrot.lane.b32.xlu0 %v1437_v9, %s1366_s7 }
 0x307   :  { %773 = vrot.lane.b32.xlu1 %v1442_v10, %s1366_s7  ;;  %775 = vrot.lane.b32.xlu0 %v1425_v6, %s1366_s7 }
 0x30b   :  { %777 = vrot.lane.b32.xlu1 %v1430_v7, %s1366_s7  ;;  %779 = vrot.lane.b32.xlu0 %v1411_v2, %s1366_s7 }
 0x30f   :  { %781 = vrot.lane.b32.xlu1 %v1420_v5, %s1366_s7  ;;  %783 = vrot.lane.b32.xlu0 %v1401_v0, %s1366_s7 }
 0x313   :  { %785 = vrot.lane.b32.xlu1 %v1406_v1, %s1366_s7 }
 0x34d   :  { %v818_v9 = vpop.permute.xlu0 %817 }
 0x34e   :  { %v847_v10 = vmul.f32 %v818_v9, %v1724_v29 }
 0x350   :  { %867 = vrot.lane.b32.xlu0 %v847_v10, %s1366_s7 }
 0x351   :  { %v820_v6 = vpop.permute.xlu1 %819 }
 0x352   :  { %v848_v7 = vmul.f32 %v820_v6, %v1730_v34 }
 0x354   :  { %869 = vrot.lane.b32.xlu1 %v848_v7, %s1366_s7 }
 0x355   :  { %v822_v2 = vpop.permute.xlu0 %821 }
 0x356   :  { %v849_v13 = vmul.f32 %v822_v2, %v1736_v44 }
 0x358   :  { %871 = vrot.lane.b32.xlu0 %v849_v13, %s1366_s7 }
 0x359   :  { %v824_v5 = vpop.permute.xlu1 %823 }
 0x35a   :  { %v850_v0 = vmul.f32 %v824_v5, %v1742_v57 }
 0x35c   :  { %873 = vrot.lane.b32.xlu1 %v850_v0, %s1366_s7 }
 0x35e   :  { %v826_v1 = vpop.permute.xlu0 %825 }
 0x35f   :  { %v851_v14 = vmul.f32 %v826_v1, %v1748_v4 }
 0x361   :  { %875 = vrot.lane.b32.xlu0 %v851_v14, %s1366_s7 }
 0x362   :  { %v828_v23 = vpop.permute.xlu1 %827 }
 0x363   :  { %v852_v28 = vmul.f32 %v828_v23, %v1754_v15 }
 0x365   :  { %877 = vrot.lane.b32.xlu1 %v852_v28, %s1366_s7 }
 0x366   :  { %v830_v30 = vpop.permute.xlu0 %829 }
 0x367   :  { %v853_v31 = vmul.f32 %v830_v30, %v1760_v19 }
 0x369   :  { %879 = vrot.lane.b32.xlu0 %v853_v31, %s1366_s7 }
 0x36a   :  { %v832_v41 = vpop.permute.xlu1 %831 }
 0x36b   :  { %v854_v35 = vmul.f32 %v832_v41, %v1766_v22 }
 0x36d   :  { %881 = vrot.lane.b32.xlu1 %v854_v35, %s1366_s7  ;;  %v834_v36 = vpop.permute.xlu0 %833 }
 0x36e   :  { %v855_v37 = vmul.f32 %v834_v36, %v1772_v26 }
 0x370   :  { %883 = vrot.lane.b32.xlu0 %v855_v37, %s1366_s7 }
 0x371   :  { %v836_v40 = vpop.permute.xlu1 %835  ;;  %v768_v43 = vpop.permute.xlu0 %767 }
 0x372   :  { %v856_v42 = vmul.f32 %v836_v40, %v1778_v18  ;;  %v797_v46 = vmul.f32 %v768_v43, %v1724_v29 }
 0x374   :  { %885 = vrot.lane.b32.xlu1 %v856_v42, %s1366_s7 }
 0x375   :  { %v770_v33 = vpop.permute.xlu1 %769  ;;  %v772_v38 = vpop.permute.xlu0 %771 }
 0x376   :  { %v798_v56 = vmul.f32 %v770_v33, %v1730_v34  ;;  %v799_v60 = vmul.f32 %v772_v38, %v1736_v44 }
 0x379   :  { %v774_v32 = vpop.permute.xlu1 %773  ;;  %v776_v39 = vpop.permute.xlu0 %775 }
 0x37a   :  { %v800_v63 = vmul.f32 %v774_v32, %v1742_v57  ;;  %v801_v16 = vmul.f32 %v776_v39, %v1748_v4 }
 0x37d   :  { %v778_v47 = vpop.permute.xlu1 %777  ;;  %v780_v48 = vpop.permute.xlu0 %779 }
 0x37e   :  { %v802_v3 = vmul.f32 %v778_v47, %v1754_v15  ;;  %v803_v25 = vmul.f32 %v780_v48, %v1760_v19 }
 0x381   :  { %v782_v49 = vpop.permute.xlu1 %781  ;;  %v784_v53 = vpop.permute.xlu0 %783 }
 0x382   :  { %v804_v10 = vmul.f32 %v782_v49, %v1766_v22  ;;  %v805_v2 = vmul.f32 %v784_v53, %v1772_v26 }
 0x385   :  { %v786_v50 = vpop.permute.xlu1 %785 }
 0x386   :  { %v806_v1 = vmul.f32 %v786_v50, %v1778_v18 }
 0x3c2   :  { %v868_v51 = vpop.permute.xlu0 %867 }
 0x3c3   :  { %v897_v54 = vadd.f32 %v868_v51, %v797_v46 }
 0x3c5   :  { %1338 = vtanh.f32 %v897_v54 }
 0x3c6   :  { %v870_v59 = vpop.permute.xlu1 %869 }
 0x3c7   :  { %v898_v58 = vadd.f32 %v870_v59, %v798_v56 }
 0x3c9   :  { %1340 = vtanh.f32 %v898_v58 }
 0x3ca   :  { %v872_v61 = vpop.permute.xlu0 %871 }
 0x3cb   :  { %v899_v62 = vadd.f32 %v872_v61, %v799_v60 }
 0x3cd   :  { %1342 = vtanh.f32 %v899_v62 }
 0x3ce   :  { %v874_v8 = vpop.permute.xlu1 %873 }
 0x3cf   :  { %v900_v11 = vadd.f32 %v874_v8, %v800_v63 }
 0x3d1   :  { %1344 = vtanh.f32 %v900_v11 }
 0x3d2   :  { %v1339_v12 = vpop.eup %1338 }
 0x3d3   :  { %v876_v17 = vpop.permute.xlu0 %875  ;;  %927 = vrot.lane.b32.xlu0 %v1339_v12, %s1365_s4 }
 0x3d4   :  { %v901_v55 = vadd.f32 %v876_v17, %v801_v16 }
 0x3d6   :  { %v1341_v20 = vpop.eup %1340  ;;  %1346 = vtanh.f32 %v901_v55 }
 0x3d7   :  { %v878_v21 = vpop.permute.xlu1 %877  ;;  %929 = vrot.lane.b32.xlu1 %v1341_v20, %s1365_s4 }
 0x3d8   :  { %v902_v52 = vadd.f32 %v878_v21, %v802_v3 }
 0x3da   :  { %v1343_v24 = vpop.eup %1342  ;;  %1348 = vtanh.f32 %v902_v52 }
 0x3db   :  { %v880_v45 = vpop.permute.xlu0 %879  ;;  %931 = vrot.lane.b32.xlu0 %v1343_v24, %s1365_s4 }
 0x3dc   :  { %v903_v27 = vadd.f32 %v880_v45, %v803_v25 }
 0x3de   :  { %v1345_v9 = vpop.eup %1344  ;;  %1350 = vtanh.f32 %v903_v27 }
 0x3df   :  { %v882_v6 = vpop.permute.xlu1 %881  ;;  %933 = vrot.lane.b32.xlu1 %v1345_v9, %s1365_s4 }
 0x3e0   :  { %v904_v7 = vadd.f32 %v882_v6, %v804_v10 }
 0x3e2   :  { %1352 = vtanh.f32 %v904_v7  ;;  %v884_v13 = vpop.permute.xlu0 %883 }
 0x3e3   :  { %v1347_v5 = vpop.eup %1346  ;;  %v905_v0 = vadd.f32 %v884_v13, %v805_v2 }
 0x3e4   :  { %935 = vrot.lane.b32.xlu0 %v1347_v5, %s1365_s4 }
 0x3e5   :  { %1354 = vtanh.f32 %v905_v0 }
 0x3e6   :  { %v886_v14 = vpop.permute.xlu1 %885 }
 0x3e7   :  { %v1349_v23 = vpop.eup %1348  ;;  %v906_v28 = vadd.f32 %v886_v14, %v806_v1 }
 0x3e8   :  { %937 = vrot.lane.b32.xlu1 %v1349_v23, %s1365_s4 }
 0x3e9   :  { %1356 = vtanh.f32 %v906_v28 }
 0x3eb   :  { %v1351_v30 = vpop.eup %1350 }
 0x3ec   :  { %939 = vrot.lane.b32.xlu0 %v1351_v30, %s1365_s4 }
 0x3ef   :  { %v1353_v31 = vpop.eup %1352 }
 0x3f0   :  { %941 = vrot.lane.b32.xlu1 %v1353_v31, %s1365_s4 }
 0x3f2   :  { %v1355_v41 = vpop.eup %1354 }
 0x3f3   :  { %943 = vrot.lane.b32.xlu0 %v1355_v41, %s1365_s4 }
 0x3f6   :  { %v1357_v35 = vpop.eup %1356 }
 0x3f7   :  { %945 = vrot.lane.b32.xlu1 %v1357_v35, %s1365_s4  ;;  %1017 = vrot.lane.b32.xlu0 %v897_v54, %s1367_s0 }
 0x3fb   :  { %1019 = vrot.lane.b32.xlu1 %v898_v58, %s1367_s0  ;;  %1021 = vrot.lane.b32.xlu0 %v899_v62, %s1367_s0 }
 0x3ff   :  { %1023 = vrot.lane.b32.xlu1 %v900_v11, %s1367_s0  ;;  %1025 = vrot.lane.b32.xlu0 %v901_v55, %s1367_s0 }
 0x403   :  { %1027 = vrot.lane.b32.xlu1 %v902_v52, %s1367_s0  ;;  %1029 = vrot.lane.b32.xlu0 %v903_v27, %s1367_s0 }
 0x407   :  { %1031 = vrot.lane.b32.xlu1 %v904_v7, %s1367_s0 }
 0x445   :  { %v928_v36 = vpop.permute.xlu0 %927 }
 0x446   :  { %v957_v37 = vmul.f32 %v928_v36, %v1724_v29 }
 0x448   :  { %977 = vrot.lane.b32.xlu0 %v957_v37, %s1365_s4 }
 0x449   :  { %v930_v40 = vpop.permute.xlu1 %929 }
 0x44a   :  { %v958_v42 = vmul.f32 %v930_v40, %v1730_v34 }
 0x44c   :  { %979 = vrot.lane.b32.xlu1 %v958_v42, %s1365_s4 }
 0x44d   :  { %v932_v43 = vpop.permute.xlu0 %931 }
 0x44e   :  { %v959_v33 = vmul.f32 %v932_v43, %v1736_v44 }
 0x450   :  { %981 = vrot.lane.b32.xlu0 %v959_v33, %s1365_s4 }
 0x451   :  { %v934_v38 = vpop.permute.xlu1 %933 }
 0x452   :  { %v960_v32 = vmul.f32 %v934_v38, %v1742_v57 }
 0x454   :  { %983 = vrot.lane.b32.xlu1 %v960_v32, %s1365_s4 }
 0x456   :  { %v936_v39 = vpop.permute.xlu0 %935 }
 0x457   :  { %v961_v29 = vmul.f32 %v936_v39, %v1748_v4 }
 0x459   :  { %985 = vrot.lane.b32.xlu0 %v961_v29, %s1365_s4 }
 0x45a   :  { %v938_v47 = vpop.permute.xlu1 %937 }
 0x45b   :  { %v962_v34 = vmul.f32 %v938_v47, %v1754_v15 }
 0x45d   :  { %987 = vrot.lane.b32.xlu1 %v962_v34, %s1365_s4 }
 0x45e   :  { %v940_v48 = vpop.permute.xlu0 %939 }
 0x45f   :  { %v963_v44 = vmul.f32 %v940_v48, %v1760_v19 }
 0x461   :  { %989 = vrot.lane.b32.xlu0 %v963_v44, %s1365_s4 }
 0x462   :  { %v942_v49 = vpop.permute.xlu1 %941 }
 0x463   :  { %v964_v57 = vmul.f32 %v942_v49, %v1766_v22 }
 0x465   :  { %991 = vrot.lane.b32.xlu1 %v964_v57, %s1365_s4  ;;  %v944_v53 = vpop.permute.xlu0 %943 }
 0x466   :  { %v965_v4 = vmul.f32 %v944_v53, %v1772_v26 }
 0x468   :  { %993 = vrot.lane.b32.xlu0 %v965_v4, %s1365_s4 }
 0x469   :  { %v946_v46 = vpop.permute.xlu1 %945  ;;  %v1018_v19 = vpop.permute.xlu0 %1017 }
 0x46a   :  { %v966_v15 = vmul.f32 %v946_v46, %v1778_v18 }
 0x46c   :  { %995 = vrot.lane.b32.xlu1 %v966_v15, %s1365_s4  ;;  %1033 = vrot.lane.b32.xlu0 %v905_v0, %s1367_s0 }
 0x46d   :  { %v1020_v50 = vpop.permute.xlu1 %1019  ;;  %v1022_v51 = vpop.permute.xlu0 %1021 }
 0x470   :  { %1035 = vrot.lane.b32.xlu1 %v906_v28, %s1367_s0 }
 0x471   :  { %v1024_v22 = vpop.permute.xlu1 %1023  ;;  %v1026_v54 = vpop.permute.xlu0 %1025 }
 0x475   :  { %v1028_v56 = vpop.permute.xlu1 %1027  ;;  %v1030_v59 = vpop.permute.xlu0 %1029 }
 0x479   :  { %v1032_v26 = vpop.permute.xlu1 %1031 }
 0x4ba   :  { %v978_v58 = vpop.permute.xlu0 %977 }
 0x4bb   :  { %v1047_v60 = vsel %vm590_vm3, %v978_v58, %v1018_v19 }
 0x4bc   :  { %1058 = vst.msk [vmem:[%s1927_s5] sm:$0xff] %vm1057_vm7, %v1047_v60 }
 0x4be   :  { %v980_v18 = vpop.permute.xlu1 %979 }
 0x4bf   :  { %v1048_v61 = vsel %vm590_vm3, %v980_v18, %v1020_v50 }
 0x4c0   :  { %1059 = vst.msk [vmem:[%s1927_s5 + $0x8] sm:$0xff] %vm1057_vm7, %v1048_v61 }
 0x4c2   :  { %v982_v62 = vpop.permute.xlu0 %981 }
 0x4c3   :  { %v1049_v63 = vsel %vm590_vm3, %v982_v62, %v1022_v51 }
 0x4c4   :  { %1060 = vst.msk [vmem:[%s1927_s5 + $0x10] sm:$0xff] %vm1057_vm7, %v1049_v63 }
 0x4c6   :  { %v984_v8 = vpop.permute.xlu1 %983 }
 0x4c7   :  { %v1050_v11 = vsel %vm590_vm3, %v984_v8, %v1024_v22 }
 0x4c8   :  { %1061 = vst.msk [vmem:[%s1927_s5 + $0x18] sm:$0xff] %vm1057_vm7, %v1050_v11 }
 0x4cb   :  { %v986_v12 = vpop.permute.xlu0 %985 }
 0x4cc   :  { %v1051_v16 = vsel %vm590_vm3, %v986_v12, %v1026_v54 }
 0x4cd   :  { %1062 = vst.msk [vmem:[%s1927_s5 + $0x20] sm:$0xff] %vm1057_vm7, %v1051_v16 }
 0x4cf   :  { %v988_v17 = vpop.permute.xlu1 %987 }
 0x4d0   :  { %v1052_v55 = vsel %vm590_vm3, %v988_v17, %v1028_v56 }
 0x4d1   :  { %1063 = vst.msk [vmem:[%s1927_s5 + $0x28] sm:$0xff] %vm1057_vm7, %v1052_v55 }
 0x4d3   :  { %v990_v20 = vpop.permute.xlu0 %989 }
 0x4d4   :  { %v1053_v3 = vsel %vm590_vm3, %v990_v20, %v1030_v59 }
 0x4d5   :  { %1064 = vst.msk [vmem:[%s1927_s5 + $0x30] sm:$0xff] %vm1057_vm7, %v1053_v3 }
 0x4d7   :  { %v992_v21 = vpop.permute.xlu1 %991 }
 0x4d8   :  { %v1054_v52 = vsel %vm590_vm3, %v992_v21, %v1032_v26 }
 0x4d9   :  { %1065 = vst.msk [vmem:[%s1927_s5 + $0x38] sm:$0xff] %vm1057_vm7, %v1054_v52 }
 0x4da   :  { %v994_v24 = vpop.permute.xlu0 %993 }
 0x4de   :  { %v996_v25 = vpop.permute.xlu1 %995  ;;  %v1034_v45 = vpop.permute.xlu0 %1033 }
 0x4df   :  { %v1055_v27 = vsel %vm590_vm3, %v994_v24, %v1034_v45 }
 0x4e0   :  { %1066 = vst.msk [vmem:[%s1927_s5 + $0x40] sm:$0xff] %vm1057_vm7, %v1055_v27 }
 0x4e2   :  { %v1036_v9 = vpop.permute.xlu1 %1035 }
 0x4e3   :  { %v1056_v10 = vsel %vm590_vm3, %v996_v25, %v1036_v9 }
 0x4e4   :  { %1067 = vst.msk [vmem:[%s1927_s5 + $0x48] sm:$0xff] %vm1057_vm7, %v1056_v10 }

</bundles_post_ra>
